<compile_context>
chip_gen: v6e
topology: v6e:2x2x1
jax: 0.10.0
libtpu: 0.0.40
codegen_flags: <defaults>
</compile_context>

<pallas_src>
import jax
import jax.numpy as jnp
from jax import lax
from jax.experimental import pallas as pl
from jax.experimental.pallas import tpu as pltpu


_LANE = 128
_SUBLANE = 8
# Stay well under v7x's 32 MiB default scoped VMEM (smallest of v5e/v6e/v7x),
# leaving headroom for compiler scratch.
_VMEM_BUDGET_BYTES = 24 * 1024 * 1024
_TM_CAP = 2048


def _round_up(n, mult):
    return ((n + mult - 1) // mult) * mult


def _pick_tm(m, cin, cout_pad, itemsize):
    """Largest M tile (multiple of 8, <= cap) whose pipeline fits the VMEM budget."""
    elt = max(itemsize, 4)  # f32 accumulate worst case
    tm = min(_TM_CAP, _round_up(m, _SUBLANE))
    while tm > _SUBLANE:
        # Double-buffered x and out tiles + resident weight + bias.
        need = (2 * tm * cin + 2 * tm * cout_pad) * elt
        need += (cout_pad * cin + cout_pad) * elt
        if need <= _VMEM_BUDGET_BYTES:
            break
        tm = max(_SUBLANE, _round_up(tm // 2, _SUBLANE))
    return tm


def _nin_kernel(x_ref, w_ref, b_ref, o_ref):
    # x_ref: (TM, Cin)   w_ref: (Cout_pad, Cin)   b_ref: (1, Cout_pad)
    # o_ref: (TM, Cout_pad)
    # Contract x's last axis against w's last axis (PyTorch (out, in) layout),
    # i.e. x @ W^T, without any host-side transpose.
    acc = lax.dot_general(
        x_ref[...], w_ref[...],
        dimension_numbers=(((1,), (1,)), ((), ())),
        preferred_element_type=jnp.float32)
    o_ref[...] = (acc + b_ref[...]).astype(o_ref.dtype)


@jax.jit
def nin_forward(x, weight, bias):
    """x: (..., Cin); weight: (Cout, Cin) [PyTorch layout]; bias: (Cout,)."""
    cin = x.shape[-1]
    cout = weight.shape[0]
    lead = x.shape[:-1]
    m = 1
    for d in lead:
        m *= d

    # Lane-dense output path: pad Cout up to a multiple of 128.
    cout_pad = _round_up(cout, _LANE)

    itemsize = jnp.dtype(x.dtype).itemsize
    tm = _pick_tm(m, cin, cout_pad, itemsize)
    m_pad = _round_up(m, tm)

    x2d = x.reshape(m, cin)
    if m_pad != m:
        x2d = jnp.pad(x2d, ((0, m_pad - m), (0, 0)))

    w = weight
    b = bias.astype(jnp.float32)  # pre-cast once; kernel epilogue stays f32-add only
    if cout_pad != cout:
        w = jnp.pad(w, ((0, cout_pad - cout), (0, 0)))
        b = jnp.pad(b, ((0, cout_pad - cout),))
    b2d = b.reshape(1, cout_pad)

    grid = (m_pad // tm,)

    out2d = pl.pallas_call(
        _nin_kernel,
        out_shape=jax.ShapeDtypeStruct((m_pad, cout_pad), x.dtype),
        grid_spec=pltpu.PrefetchScalarGridSpec(
            num_scalar_prefetch=0,
            grid=grid,
            in_specs=[
                pl.BlockSpec((tm, cin), lambda i: (i, 0)),        # streamed per tile
                pl.BlockSpec((cout_pad, cin), lambda i: (0, 0)),  # resident weight
                pl.BlockSpec((1, cout_pad), lambda i: (0, 0)),    # resident bias
            ],
            out_specs=pl.BlockSpec((tm, cout_pad), lambda i: (i, 0)),
        ),
        compiler_params=pltpu.CompilerParams(
            dimension_semantics=("parallel",)),
    )(x2d, w, b2d)

    out2d = out2d[:m, :cout]
    return out2d.reshape(*lead, cout)


def init_nin_params(key, in_channels, out_channels, dtype=jnp.float32):
    """Deterministic init matching nn.Linear's default: U(-1/sqrt(in), 1/sqrt(in))."""
    kw, kb = jax.random.split(key)
    bound = 1.0 / (in_channels ** 0.5)
    weight = jax.random.uniform(
        kw, (out_channels, in_channels), dtype=dtype, minval=-bound, maxval=bound)
    bias = jax.random.uniform(
        kb, (out_channels,), dtype=dtype, minval=-bound, maxval=bound)
    return weight, bias


if __name__ == "__main__":
    key = jax.random.PRNGKey(0)
    k_x, k_p = jax.random.split(key)

    B, H, W, C_IN, C_OUT = 2, 16, 16, 4, 8
    x = jax.random.normal(k_x, (B, H, W, C_IN), dtype=jnp.float32)
    weight, bias = init_nin_params(k_p, C_IN, C_OUT)

    y = nin_forward(x, weight, bias)
    jax.block_until_ready(y)

    # Reference check against plain-JAX nn.Linear semantics.
    y_ref = jnp.einsum("bhwi,oi->bhwo", x, weight) + bias
    assert y.shape == (B, H, W, C_OUT)
    assert jnp.allclose(y, y_ref, atol=1e-5, rtol=1e-5)

    print("KERNEL_OK")
</pallas_src>

<mosaic_0001>
module attributes {stable_mosaic.version = 11 : i64} {
  func.func @_nin_kernel(%arg0: i32, %arg1: memref<512x4xf32, #tpu.memory_space<vmem>>, %arg2: memref<128x4xf32, #tpu.memory_space<vmem>>, %arg3: memref<1x128xf32, #tpu.memory_space<vmem>>, %arg4: memref<512x128xf32, #tpu.memory_space<vmem>>) attributes {dimension_semantics = [#tpu.dimension_semantics<parallel>], iteration_bounds = array<i64: 1>, scalar_prefetch = 0 : i64, scratch_operands = 0 : i64, tpu.core_type = #tpu.core_type<tc>, window_params = [{transform_indices = @transform_0, window_bounds = array<i64: 512, 4>}, {pipeline_mode = #tpu.pipeline_mode<synchronous>, transform_indices = @transform_1, window_bounds = array<i64: 128, 4>}, {pipeline_mode = #tpu.pipeline_mode<synchronous>, transform_indices = @transform_2, window_bounds = array<i64: 1, 128>}, {transform_indices = @transform_3, window_bounds = array<i64: 512, 128>}]} {
    %c0 = arith.constant 0 : index
    %c0_0 = arith.constant 0 : index
    %0 = vector.load %arg1[%c0, %c0_0] : memref<512x4xf32, #tpu.memory_space<vmem>>, vector<512x4xf32>
    %c0_1 = arith.constant 0 : index
    %c0_2 = arith.constant 0 : index
    %1 = vector.load %arg2[%c0_1, %c0_2] : memref<128x4xf32, #tpu.memory_space<vmem>>, vector<128x4xf32>
    %cst = arith.constant dense<0.000000e+00> : vector<512x128xf32>
    %2 = tpu.matmul %0, %1, %cst {dimension_numbers = #tpu.dot_dimension_numbers<[1], [1], [0], [0], [0, 0, 1, 0], [], []>} : vector<512x4xf32>, vector<128x4xf32>, vector<512x128xf32> -> vector<512x128xf32>
    %c0_3 = arith.constant 0 : index
    %c0_4 = arith.constant 0 : index
    %3 = vector.load %arg3[%c0_3, %c0_4] : memref<1x128xf32, #tpu.memory_space<vmem>>, vector<1x128xf32>
    %4 = vector.broadcast %3 : vector<1x128xf32> to vector<512x128xf32>
    %5 = arith.addf %2, %4 : vector<512x128xf32>
    %c0_5 = arith.constant 0 : index
    %c0_6 = arith.constant 0 : index
    %6 = vector.load %arg4[%c0_5, %c0_6] : memref<512x128xf32, #tpu.memory_space<vmem>>, vector<512x128xf32>
    tpu.vector_store %arg4[%c0_5, %c0_6], %5 {strides = array<i32>} : memref<512x128xf32, #tpu.memory_space<vmem>>, vector<512x128xf32>,
    return
  }
  func.func @transform_0(%arg0: i32) -> (i32, i32) {
    %c0_i32 = arith.constant 0 : i32
    %c0_i32_0 = arith.constant 0 : i32
    return %arg0, %c0_i32 : i32, i32
  }
  func.func @transform_1(%arg0: i32) -> (i32, i32) {
    %c0_i32 = arith.constant 0 : i32
    %c0_i32_0 = arith.constant 0 : i32
    %c0_i32_1 = arith.constant 0 : i32
    return %c0_i32, %c0_i32_0 : i32, i32
  }
  func.func @transform_2(%arg0: i32) -> (i32, i32) {
    %c0_i32 = arith.constant 0 : i32
    %c0_i32_0 = arith.constant 0 : i32
    %c0_i32_1 = arith.constant 0 : i32
    return %c0_i32, %c0_i32_0 : i32, i32
  }
  func.func @transform_3(%arg0: i32) -> (i32, i32) {
    %c0_i32 = arith.constant 0 : i32
    %c0_i32_0 = arith.constant 0 : i32
    return %arg0, %c0_i32 : i32, i32
  }
}

</mosaic_0001>

<bundles_post_ra>
// kernel: nin_forward.1
= control target key start
LH: loop header
LB: loop body
LE: loop exit
PB: predicated region body
PF: predicated region fallthrough
CT: control target
= control target key end

     0   :  { %vm101_vm0 = vcmask 31744   ;;  %s1765_s1 = inlined_call_operand.vmem [shape: f32[128,4], index: 1, kind: input, shape index: {}]   ;;  %s1766_s0 = inlined_call_operand.vmem [shape: f32[512,4], index: 0, kind: input, shape index: {}]   ;;  %s1767_s2 = inlined_call_operand.vmem [shape: f32[1,128], index: 2, kind: input, shape index: {}]   ;;  %s1768_s3 = inlined_call_operand.vmem [shape: f32[512,128], index: 3, kind: output, shape index: {}]  }
   0x1   :  { %v93_v0 = vld [vmem:[%s1765_s1 + $0x78] sm:$0xff]  ;;  %v92_v1 = vld [vmem:[%s1765_s1 + $0x70] sm:$0xff]  ;;  %v91_v2 = vld [vmem:[%s1765_s1 + $0x68] sm:$0xff] }
   0x2   :  { %956 = vmatprep.subr.msk.mxu0 %vm101_vm0, %v93_v0  ;;  %1084 = vmatprep.subr.msk.mxu1 %vm101_vm0, %v93_v0  ;;  %v14_v3 = vld [vmem:[%s1766_s0] sm:$0xff]  ;;  %v89_v6 = vld [vmem:[%s1765_s1 + $0x58] sm:$0xff]  ;;  %v88_v7 = vld [vmem:[%s1765_s1 + $0x50] sm:$0xff] }
   0x3   :  { %957 = vmatpush3.xpose.msk.msra.mxu0 %vm101_vm0, %v93_v0  ;;  %1100 = vmatpush3.xpose.msk.msra.mxu1 %vm101_vm0, %v93_v0  ;;  %v46_v4 = vld [vmem:[%s1766_s0 + $0x100] sm:$0xff]  ;;  %v87_v8 = vld [vmem:[%s1765_s1 + $0x48] sm:$0xff]  ;;  %v85_v10 = vld [vmem:[%s1765_s1 + $0x38] sm:$0xff] }
   0x4   :  { %958 = vmatprep.subr.msk.mxu0 %vm101_vm0, %v92_v1  ;;  %1085 = vmatprep.subr.msk.mxu1 %vm101_vm0, %v92_v1  ;;  %v90_v5 = vld [vmem:[%s1765_s1 + $0x60] sm:$0xff]  ;;  %v84_v11 = vld [vmem:[%s1765_s1 + $0x30] sm:$0xff]  ;;  %v83_v12 = vld [vmem:[%s1765_s1 + $0x28] sm:$0xff] }
   0x5   :  { %988 = vmatprep.mubr.msk.f32.mxu0 %vm101_vm0, %v14_v3  ;;  %1036 = vmatprep.mubr.msk.f32.mxu1 %vm101_vm0, %v46_v4  ;;  %v86_v9 = vld [vmem:[%s1765_s1 + $0x40] sm:$0xff]  ;;  %v81_v14 = vld [vmem:[%s1765_s1 + $0x18] sm:$0xff]  ;;  %v80_v15 = vld [vmem:[%s1765_s1 + $0x10] sm:$0xff] }
   0x6   :  { %v82_v13 = vld [vmem:[%s1765_s1 + $0x20] sm:$0xff]  ;;  %v79_v16 = vld [vmem:[%s1765_s1 + $0x8] sm:$0xff]  ;;  %v16_v20 = vld [vmem:[%s1766_s0 + $0x10] sm:$0xff] }
   0x7   :  { %959 = vmatpush3.xpose.msk.msra.mxu0 %vm101_vm0, %v92_v1  ;;  %1101 = vmatpush3.xpose.msk.msra.mxu1 %vm101_vm0, %v92_v1  ;;  %v78_v17 = vld [vmem:[%s1765_s1] sm:$0xff]  ;;  %v15_v18 = vld [vmem:[%s1766_s0 + $0x8] sm:$0xff]  ;;  %v48_v21 = vld [vmem:[%s1766_s0 + $0x110] sm:$0xff] }
   0x8   :  { %960 = vmatprep.subr.msk.mxu0 %vm101_vm0, %v91_v2  ;;  %1086 = vmatprep.subr.msk.mxu1 %vm101_vm0, %v91_v2  ;;  %v47_v19 = vld [vmem:[%s1766_s0 + $0x108] sm:$0xff]  ;;  %v17_v22 = vld [vmem:[%s1766_s0 + $0x18] sm:$0xff]  ;;  %v18_v24 = vld [vmem:[%s1766_s0 + $0x20] sm:$0xff] }
   0x9   :  { %v49_v23 = vld [vmem:[%s1766_s0 + $0x118] sm:$0xff]  ;;  %v50_v25 = vld [vmem:[%s1766_s0 + $0x120] sm:$0xff]  ;;  %v19_v26 = vld [vmem:[%s1766_s0 + $0x28] sm:$0xff] }
   0xa   :  { %v51_v27 = vld [vmem:[%s1766_s0 + $0x128] sm:$0xff]  ;;  %v20_v28 = vld [vmem:[%s1766_s0 + $0x30] sm:$0xff]  ;;  %v21_v30 = vld [vmem:[%s1766_s0 + $0x38] sm:$0xff] }
   0xb   :  { %961 = vmatpush3.xpose.msk.msra.mxu0 %vm101_vm0, %v91_v2  ;;  %1102 = vmatpush3.xpose.msk.msra.mxu1 %vm101_vm0, %v91_v2  ;;  %v52_v29 = vld [vmem:[%s1766_s0 + $0x130] sm:$0xff]  ;;  %v53_v31 = vld [vmem:[%s1766_s0 + $0x138] sm:$0xff]  ;;  %v22_v32 = vld [vmem:[%s1766_s0 + $0x40] sm:$0xff] }
   0xc   :  { %962 = vmatprep.subr.msk.mxu0 %vm101_vm0, %v90_v5  ;;  %1087 = vmatprep.subr.msk.mxu1 %vm101_vm0, %v90_v5  ;;  %v54_v33 = vld [vmem:[%s1766_s0 + $0x140] sm:$0xff]  ;;  %v23_v34 = vld [vmem:[%s1766_s0 + $0x48] sm:$0xff]  ;;  %v24_v36 = vld [vmem:[%s1766_s0 + $0x50] sm:$0xff] }
   0xd   :  { %v55_v35 = vld [vmem:[%s1766_s0 + $0x148] sm:$0xff]  ;;  %v56_v37 = vld [vmem:[%s1766_s0 + $0x150] sm:$0xff]  ;;  %v25_v38 = vld [vmem:[%s1766_s0 + $0x58] sm:$0xff] }
   0xe   :  { %v57_v39 = vld [vmem:[%s1766_s0 + $0x158] sm:$0xff]  ;;  %v26_v40 = vld [vmem:[%s1766_s0 + $0x60] sm:$0xff]  ;;  %v27_v42 = vld [vmem:[%s1766_s0 + $0x68] sm:$0xff] }
   0xf   :  { %963 = vmatpush3.xpose.msk.msra.mxu0 %vm101_vm0, %v90_v5  ;;  %1103 = vmatpush3.xpose.msk.msra.mxu1 %vm101_vm0, %v90_v5  ;;  %v58_v41 = vld [vmem:[%s1766_s0 + $0x160] sm:$0xff]  ;;  %v59_v43 = vld [vmem:[%s1766_s0 + $0x168] sm:$0xff]  ;;  %v28_v44 = vld [vmem:[%s1766_s0 + $0x70] sm:$0xff] }
  0x10   :  { %964 = vmatprep.subr.msk.mxu0 %vm101_vm0, %v89_v6  ;;  %1088 = vmatprep.subr.msk.mxu1 %vm101_vm0, %v89_v6  ;;  %v60_v45 = vld [vmem:[%s1766_s0 + $0x170] sm:$0xff]  ;;  %v29_v46 = vld [vmem:[%s1766_s0 + $0x78] sm:$0xff]  ;;  %v30_v48 = vld [vmem:[%s1766_s0 + $0x80] sm:$0xff] }
  0x11   :  { %v61_v47 = vld [vmem:[%s1766_s0 + $0x178] sm:$0xff]  ;;  %v62_v49 = vld [vmem:[%s1766_s0 + $0x180] sm:$0xff]  ;;  %v31_v50 = vld [vmem:[%s1766_s0 + $0x88] sm:$0xff] }
  0x12   :  { %v63_v51 = vld [vmem:[%s1766_s0 + $0x188] sm:$0xff]  ;;  %v32_v52 = vld [vmem:[%s1766_s0 + $0x90] sm:$0xff]  ;;  %v33_v54 = vld [vmem:[%s1766_s0 + $0x98] sm:$0xff] }
  0x13   :  { %965 = vmatpush3.xpose.msk.msra.mxu0 %vm101_vm0, %v89_v6  ;;  %1104 = vmatpush3.xpose.msk.msra.mxu1 %vm101_vm0, %v89_v6  ;;  %v64_v53 = vld [vmem:[%s1766_s0 + $0x190] sm:$0xff]  ;;  %v65_v55 = vld [vmem:[%s1766_s0 + $0x198] sm:$0xff]  ;;  %v34_v56 = vld [vmem:[%s1766_s0 + $0xa0] sm:$0xff] }
  0x14   :  { %966 = vmatprep.subr.msk.mxu0 %vm101_vm0, %v88_v7  ;;  %1089 = vmatprep.subr.msk.mxu1 %vm101_vm0, %v88_v7  ;;  %v66_v57 = vld [vmem:[%s1766_s0 + $0x1a0] sm:$0xff]  ;;  %v35_v58 = vld [vmem:[%s1766_s0 + $0xa8] sm:$0xff]  ;;  %v36_v60 = vld [vmem:[%s1766_s0 + $0xb0] sm:$0xff] }
  0x15   :  { %v67_v59 = vld [vmem:[%s1766_s0 + $0x1a8] sm:$0xff]  ;;  %v68_v61 = vld [vmem:[%s1766_s0 + $0x1b0] sm:$0xff]  ;;  %v37_v62 = vld [vmem:[%s1766_s0 + $0xb8] sm:$0xff] }
  0x16   :  { %v69_v63 = vld [vmem:[%s1766_s0 + $0x1b8] sm:$0xff]  ;;  %v38_v0 = vld [vmem:[%s1766_s0 + $0xc0] sm:$0xff]  ;;  %v39_v2 = vld [vmem:[%s1766_s0 + $0xc8] sm:$0xff] }
  0x17   :  { %967 = vmatpush3.xpose.msk.msra.mxu0 %vm101_vm0, %v88_v7  ;;  %1105 = vmatpush3.xpose.msk.msra.mxu1 %vm101_vm0, %v88_v7  ;;  %v70_v1 = vld [vmem:[%s1766_s0 + $0x1c0] sm:$0xff]  ;;  %v71_v3 = vld [vmem:[%s1766_s0 + $0x1c8] sm:$0xff]  ;;  %v40_v4 = vld [vmem:[%s1766_s0 + $0xd0] sm:$0xff] }
  0x18   :  { %968 = vmatprep.subr.msk.mxu0 %vm101_vm0, %v87_v8  ;;  %1090 = vmatprep.subr.msk.mxu1 %vm101_vm0, %v87_v8  ;;  %v72_v5 = vld [vmem:[%s1766_s0 + $0x1d0] sm:$0xff]  ;;  %v41_v6 = vld [vmem:[%s1766_s0 + $0xd8] sm:$0xff] }
  0x19   :  { %v73_v7 = vld [vmem:[%s1766_s0 + $0x1d8] sm:$0xff] }
  0x1b   :  { %969 = vmatpush3.xpose.msk.msra.mxu0 %vm101_vm0, %v87_v8  ;;  %1106 = vmatpush3.xpose.msk.msra.mxu1 %vm101_vm0, %v87_v8  ;;  %v42_v8 = vld [vmem:[%s1766_s0 + $0xe0] sm:$0xff] }
  0x1c   :  { %970 = vmatprep.subr.msk.mxu0 %vm101_vm0, %v86_v9  ;;  %1091 = vmatprep.subr.msk.mxu1 %vm101_vm0, %v86_v9 }
  0x1f   :  { %971 = vmatpush3.xpose.msk.msra.mxu0 %vm101_vm0, %v86_v9  ;;  %1107 = vmatpush3.xpose.msk.msra.mxu1 %vm101_vm0, %v86_v9  ;;  %v74_v9 = vld [vmem:[%s1766_s0 + $0x1e0] sm:$0xff] }
  0x20   :  { %972 = vmatprep.subr.msk.mxu0 %vm101_vm0, %v85_v10  ;;  %1092 = vmatprep.subr.msk.mxu1 %vm101_vm0, %v85_v10 }
  0x23   :  { %973 = vmatpush3.xpose.msk.msra.mxu0 %vm101_vm0, %v85_v10  ;;  %1108 = vmatpush3.xpose.msk.msra.mxu1 %vm101_vm0, %v85_v10  ;;  %v43_v10 = vld [vmem:[%s1766_s0 + $0xe8] sm:$0xff] }
  0x24   :  { %974 = vmatprep.subr.msk.mxu0 %vm101_vm0, %v84_v11  ;;  %1093 = vmatprep.subr.msk.mxu1 %vm101_vm0, %v84_v11 }
  0x27   :  { %975 = vmatpush3.xpose.msk.msra.mxu0 %vm101_vm0, %v84_v11  ;;  %1109 = vmatpush3.xpose.msk.msra.mxu1 %vm101_vm0, %v84_v11  ;;  %v75_v11 = vld [vmem:[%s1766_s0 + $0x1e8] sm:$0xff] }
  0x28   :  { %976 = vmatprep.subr.msk.mxu0 %vm101_vm0, %v83_v12  ;;  %1094 = vmatprep.subr.msk.mxu1 %vm101_vm0, %v83_v12 }
  0x2b   :  { %977 = vmatpush3.xpose.msk.msra.mxu0 %vm101_vm0, %v83_v12  ;;  %1110 = vmatpush3.xpose.msk.msra.mxu1 %vm101_vm0, %v83_v12  ;;  %v44_v12 = vld [vmem:[%s1766_s0 + $0xf0] sm:$0xff] }
  0x2c   :  { %978 = vmatprep.subr.msk.mxu0 %vm101_vm0, %v82_v13  ;;  %1095 = vmatprep.subr.msk.mxu1 %vm101_vm0, %v82_v13 }
  0x2f   :  { %979 = vmatpush3.xpose.msk.msra.mxu0 %vm101_vm0, %v82_v13  ;;  %1111 = vmatpush3.xpose.msk.msra.mxu1 %vm101_vm0, %v82_v13  ;;  %v76_v13 = vld [vmem:[%s1766_s0 + $0x1f0] sm:$0xff] }
  0x30   :  { %980 = vmatprep.subr.msk.mxu0 %vm101_vm0, %v81_v14  ;;  %1096 = vmatprep.subr.msk.mxu1 %vm101_vm0, %v81_v14 }
  0x33   :  { %981 = vmatpush3.xpose.msk.msra.mxu0 %vm101_vm0, %v81_v14  ;;  %1112 = vmatpush3.xpose.msk.msra.mxu1 %vm101_vm0, %v81_v14  ;;  %v45_v14 = vld [vmem:[%s1766_s0 + $0xf8] sm:$0xff] }
  0x34   :  { %982 = vmatprep.subr.msk.mxu0 %vm101_vm0, %v80_v15  ;;  %1097 = vmatprep.subr.msk.mxu1 %vm101_vm0, %v80_v15 }
  0x37   :  { %983 = vmatpush3.xpose.msk.msra.mxu0 %vm101_vm0, %v80_v15  ;;  %1113 = vmatpush3.xpose.msk.msra.mxu1 %vm101_vm0, %v80_v15  ;;  %v77_v15 = vld [vmem:[%s1766_s0 + $0x1f8] sm:$0xff] }
  0x38   :  { %984 = vmatprep.subr.msk.mxu0 %vm101_vm0, %v79_v16  ;;  %1098 = vmatprep.subr.msk.mxu1 %vm101_vm0, %v79_v16 }
  0x3b   :  { %985 = vmatpush3.xpose.msk.msra.mxu0 %vm101_vm0, %v79_v16  ;;  %1114 = vmatpush3.xpose.msk.msra.mxu1 %vm101_vm0, %v79_v16  ;;  %v1507_v16 = vld [vmem:[%s1767_s2] ss:$0 sm:$0xff] }
  0x3c   :  { %986 = vmatprep.subr.msk.mxu0 %vm101_vm0, %v78_v17  ;;  %1099 = vmatprep.subr.msk.mxu1 %vm101_vm0, %v78_v17 }
  0x3f   :  { %987 = vmatpush3.xpose.msk.msra.mxu0 %vm101_vm0, %v78_v17  ;;  %1115 = vmatpush3.xpose.msk.msra.mxu1 %vm101_vm0, %v78_v17 }
  0x42   :  { %989 = vmatmul.mubr.msk.f32.vlgmr.msra.gmra.mxu0 %vm101_vm0, %v15_v18  ;;  %1037 = vmatmul.mubr.msk.f32.vlgmr.msra.gmra.mxu1 %vm101_vm0, %v47_v19 }
  0x43   :  { %991 = vmatprep.mubr.msk.f32.mxu0 %vm101_vm0, %v16_v20  ;;  %1039 = vmatprep.mubr.msk.f32.mxu1 %vm101_vm0, %v48_v21 }
  0x46   :  { %992 = vmatmul.mubr.msk.f32.gmra.mxu0 %vm101_vm0, %v17_v22  ;;  %1040 = vmatmul.mubr.msk.f32.gmra.mxu1 %vm101_vm0, %v49_v23 }
  0x47   :  { %994 = vmatprep.mubr.msk.f32.mxu0 %vm101_vm0, %v18_v24  ;;  %1042 = vmatprep.mubr.msk.f32.mxu1 %vm101_vm0, %v50_v25 }
  0x4a   :  { %995 = vmatmul.mubr.msk.f32.gmra.mxu0 %vm101_vm0, %v19_v26  ;;  %1043 = vmatmul.mubr.msk.f32.gmra.mxu1 %vm101_vm0, %v51_v27 }
  0x4b   :  { %997 = vmatprep.mubr.msk.f32.mxu0 %vm101_vm0, %v20_v28  ;;  %1045 = vmatprep.mubr.msk.f32.mxu1 %vm101_vm0, %v52_v29 }
  0x4e   :  { %998 = vmatmul.mubr.msk.f32.gmra.mxu0 %vm101_vm0, %v21_v30  ;;  %1046 = vmatmul.mubr.msk.f32.gmra.mxu1 %vm101_vm0, %v53_v31 }
  0x4f   :  { %1000 = vmatprep.mubr.msk.f32.mxu0 %vm101_vm0, %v22_v32  ;;  %1048 = vmatprep.mubr.msk.f32.mxu1 %vm101_vm0, %v54_v33 }
  0x52   :  { %1001 = vmatmul.mubr.msk.f32.gmra.mxu0 %vm101_vm0, %v23_v34  ;;  %1049 = vmatmul.mubr.msk.f32.gmra.mxu1 %vm101_vm0, %v55_v35 }
  0x53   :  { %1003 = vmatprep.mubr.msk.f32.mxu0 %vm101_vm0, %v24_v36  ;;  %1051 = vmatprep.mubr.msk.f32.mxu1 %vm101_vm0, %v56_v37 }
  0x56   :  { %1004 = vmatmul.mubr.msk.f32.gmra.mxu0 %vm101_vm0, %v25_v38  ;;  %1052 = vmatmul.mubr.msk.f32.gmra.mxu1 %vm101_vm0, %v57_v39 }
  0x57   :  { %1006 = vmatprep.mubr.msk.f32.mxu0 %vm101_vm0, %v26_v40  ;;  %1054 = vmatprep.mubr.msk.f32.mxu1 %vm101_vm0, %v58_v41 }
  0x5a   :  { %1007 = vmatmul.mubr.msk.f32.gmra.mxu0 %vm101_vm0, %v27_v42  ;;  %1055 = vmatmul.mubr.msk.f32.gmra.mxu1 %vm101_vm0, %v59_v43 }
  0x5b   :  { %1009 = vmatprep.mubr.msk.f32.mxu0 %vm101_vm0, %v28_v44  ;;  %1057 = vmatprep.mubr.msk.f32.mxu1 %vm101_vm0, %v60_v45 }
  0x5e   :  { %1010 = vmatmul.mubr.msk.f32.gmra.mxu0 %vm101_vm0, %v29_v46  ;;  %1058 = vmatmul.mubr.msk.f32.gmra.mxu1 %vm101_vm0, %v61_v47 }
  0x5f   :  { %1012 = vmatprep.mubr.msk.f32.mxu0 %vm101_vm0, %v30_v48  ;;  %1060 = vmatprep.mubr.msk.f32.mxu1 %vm101_vm0, %v62_v49 }
  0x62   :  { %1013 = vmatmul.mubr.msk.f32.gmra.mxu0 %vm101_vm0, %v31_v50  ;;  %1061 = vmatmul.mubr.msk.f32.gmra.mxu1 %vm101_vm0, %v63_v51 }
  0x63   :  { %1015 = vmatprep.mubr.msk.f32.mxu0 %vm101_vm0, %v32_v52  ;;  %1063 = vmatprep.mubr.msk.f32.mxu1 %vm101_vm0, %v64_v53 }
  0x66   :  { %1016 = vmatmul.mubr.msk.f32.gmra.mxu0 %vm101_vm0, %v33_v54  ;;  %1064 = vmatmul.mubr.msk.f32.gmra.mxu1 %vm101_vm0, %v65_v55 }
  0x67   :  { %1018 = vmatprep.mubr.msk.f32.mxu0 %vm101_vm0, %v34_v56  ;;  %1066 = vmatprep.mubr.msk.f32.mxu1 %vm101_vm0, %v66_v57 }
  0x6a   :  { %1019 = vmatmul.mubr.msk.f32.gmra.mxu0 %vm101_vm0, %v35_v58  ;;  %1067 = vmatmul.mubr.msk.f32.gmra.mxu1 %vm101_vm0, %v67_v59 }
  0x6b   :  { %1021 = vmatprep.mubr.msk.f32.mxu0 %vm101_vm0, %v36_v60  ;;  %1069 = vmatprep.mubr.msk.f32.mxu1 %vm101_vm0, %v68_v61 }
  0x6e   :  { %1022 = vmatmul.mubr.msk.f32.gmra.mxu0 %vm101_vm0, %v37_v62  ;;  %1070 = vmatmul.mubr.msk.f32.gmra.mxu1 %vm101_vm0, %v69_v63 }
  0x6f   :  { %1024 = vmatprep.mubr.msk.f32.mxu0 %vm101_vm0, %v38_v0  ;;  %1072 = vmatprep.mubr.msk.f32.mxu1 %vm101_vm0, %v70_v1 }
  0x72   :  { %1025 = vmatmul.mubr.msk.f32.gmra.mxu0 %vm101_vm0, %v39_v2  ;;  %1073 = vmatmul.mubr.msk.f32.gmra.mxu1 %vm101_vm0, %v71_v3 }
  0x73   :  { %1027 = vmatprep.mubr.msk.f32.mxu0 %vm101_vm0, %v40_v4  ;;  %1075 = vmatprep.mubr.msk.f32.mxu1 %vm101_vm0, %v72_v5 }
  0x76   :  { %1028 = vmatmul.mubr.msk.f32.gmra.mxu0 %vm101_vm0, %v41_v6  ;;  %1076 = vmatmul.mubr.msk.f32.gmra.mxu1 %vm101_vm0, %v73_v7 }
  0x77   :  { %1030 = vmatprep.mubr.msk.f32.mxu0 %vm101_vm0, %v42_v8  ;;  %1078 = vmatprep.mubr.msk.f32.mxu1 %vm101_vm0, %v74_v9 }
  0x7a   :  { %1031 = vmatmul.mubr.msk.f32.gmra.mxu0 %vm101_vm0, %v43_v10  ;;  %1079 = vmatmul.mubr.msk.f32.gmra.mxu1 %vm101_vm0, %v75_v11 }
  0x7b   :  { %1033 = vmatprep.mubr.msk.f32.mxu0 %vm101_vm0, %v44_v12  ;;  %1081 = vmatprep.mubr.msk.f32.mxu1 %vm101_vm0, %v76_v13 }
  0x7e   :  { %1034 = vmatmul.mubr.msk.f32.gmra.mxu0 %vm101_vm0, %v45_v14  ;;  %1082 = vmatmul.mubr.msk.f32.gmra.mxu1 %vm101_vm0, %v77_v15 }
 0x102   :  { %v990_v17 = vpop.f32.mrf.mxu0  ;;  %v1038_v18 = vpop.f32.mrf.mxu1 }
 0x103   :  { %v414_v19 = vadd.f32 %v990_v17, %v1507_v16  ;;  %v574_v20 = vadd.f32 %v1038_v18, %v1507_v16 }
 0x104   :  { %v408_v21 = vpop.f32.mrf.mxu0  ;;  %v568_v22 = vpop.f32.mrf.mxu1 }
 0x105   :  { %728 = vst [vmem:[%s1768_s3 + $0x8] sm:$0xff] %v414_v19  ;;  %760 = vst [vmem:[%s1768_s3 + $0x108] sm:$0xff] %v574_v20  ;;  %v409_v23 = vadd.f32 %v1507_v16, %v408_v21  ;;  %v569_v24 = vadd.f32 %v1507_v16, %v568_v22 }
 0x106   :  { %v993_v25 = vpop.f32.mrf.mxu0  ;;  %v1041_v26 = vpop.f32.mrf.mxu1 }
 0x107   :  { %727 = vst [vmem:[%s1768_s3] sm:$0xff] %v409_v23  ;;  %759 = vst [vmem:[%s1768_s3 + $0x100] sm:$0xff] %v569_v24  ;;  %v424_v27 = vadd.f32 %v993_v25, %v1507_v16  ;;  %v584_v28 = vadd.f32 %v1041_v26, %v1507_v16 }
 0x108   :  { %v418_v29 = vpop.f32.mrf.mxu0  ;;  %v578_v30 = vpop.f32.mrf.mxu1 }
 0x109   :  { %730 = vst [vmem:[%s1768_s3 + $0x18] sm:$0xff] %v424_v27  ;;  %762 = vst [vmem:[%s1768_s3 + $0x118] sm:$0xff] %v584_v28  ;;  %v419_v31 = vadd.f32 %v1507_v16, %v418_v29  ;;  %v579_v32 = vadd.f32 %v1507_v16, %v578_v30 }
 0x10a   :  { %v996_v33 = vpop.f32.mrf.mxu0  ;;  %v1044_v34 = vpop.f32.mrf.mxu1 }
 0x10b   :  { %729 = vst [vmem:[%s1768_s3 + $0x10] sm:$0xff] %v419_v31  ;;  %761 = vst [vmem:[%s1768_s3 + $0x110] sm:$0xff] %v579_v32  ;;  %v434_v35 = vadd.f32 %v996_v33, %v1507_v16  ;;  %v594_v36 = vadd.f32 %v1044_v34, %v1507_v16 }
 0x10c   :  { %v428_v37 = vpop.f32.mrf.mxu0  ;;  %v588_v38 = vpop.f32.mrf.mxu1 }
 0x10d   :  { %732 = vst [vmem:[%s1768_s3 + $0x28] sm:$0xff] %v434_v35  ;;  %764 = vst [vmem:[%s1768_s3 + $0x128] sm:$0xff] %v594_v36  ;;  %v429_v39 = vadd.f32 %v1507_v16, %v428_v37  ;;  %v589_v40 = vadd.f32 %v1507_v16, %v588_v38 }
 0x10e   :  { %v999_v41 = vpop.f32.mrf.mxu0  ;;  %v1047_v42 = vpop.f32.mrf.mxu1 }
 0x10f   :  { %731 = vst [vmem:[%s1768_s3 + $0x20] sm:$0xff] %v429_v39  ;;  %763 = vst [vmem:[%s1768_s3 + $0x120] sm:$0xff] %v589_v40  ;;  %v444_v43 = vadd.f32 %v999_v41, %v1507_v16  ;;  %v604_v44 = vadd.f32 %v1047_v42, %v1507_v16 }
 0x110   :  { %v438_v45 = vpop.f32.mrf.mxu0  ;;  %v598_v46 = vpop.f32.mrf.mxu1 }
 0x111   :  { %734 = vst [vmem:[%s1768_s3 + $0x38] sm:$0xff] %v444_v43  ;;  %766 = vst [vmem:[%s1768_s3 + $0x138] sm:$0xff] %v604_v44  ;;  %v439_v47 = vadd.f32 %v1507_v16, %v438_v45  ;;  %v599_v48 = vadd.f32 %v1507_v16, %v598_v46 }
 0x112   :  { %v1002_v49 = vpop.f32.mrf.mxu0  ;;  %v1050_v50 = vpop.f32.mrf.mxu1 }
 0x113   :  { %733 = vst [vmem:[%s1768_s3 + $0x30] sm:$0xff] %v439_v47  ;;  %765 = vst [vmem:[%s1768_s3 + $0x130] sm:$0xff] %v599_v48  ;;  %v454_v51 = vadd.f32 %v1002_v49, %v1507_v16  ;;  %v614_v52 = vadd.f32 %v1050_v50, %v1507_v16 }
 0x114   :  { %v448_v53 = vpop.f32.mrf.mxu0  ;;  %v608_v54 = vpop.f32.mrf.mxu1 }
 0x115   :  { %736 = vst [vmem:[%s1768_s3 + $0x48] sm:$0xff] %v454_v51  ;;  %768 = vst [vmem:[%s1768_s3 + $0x148] sm:$0xff] %v614_v52  ;;  %v449_v55 = vadd.f32 %v1507_v16, %v448_v53  ;;  %v609_v56 = vadd.f32 %v1507_v16, %v608_v54 }
 0x116   :  { %v1005_v57 = vpop.f32.mrf.mxu0  ;;  %v1053_v58 = vpop.f32.mrf.mxu1 }
 0x117   :  { %735 = vst [vmem:[%s1768_s3 + $0x40] sm:$0xff] %v449_v55  ;;  %767 = vst [vmem:[%s1768_s3 + $0x140] sm:$0xff] %v609_v56  ;;  %v464_v59 = vadd.f32 %v1005_v57, %v1507_v16  ;;  %v624_v60 = vadd.f32 %v1053_v58, %v1507_v16 }
 0x118   :  { %v458_v61 = vpop.f32.mrf.mxu0  ;;  %v618_v62 = vpop.f32.mrf.mxu1 }
 0x119   :  { %738 = vst [vmem:[%s1768_s3 + $0x58] sm:$0xff] %v464_v59  ;;  %770 = vst [vmem:[%s1768_s3 + $0x158] sm:$0xff] %v624_v60  ;;  %v459_v63 = vadd.f32 %v1507_v16, %v458_v61  ;;  %v619_v0 = vadd.f32 %v1507_v16, %v618_v62 }
 0x11a   :  { %v1008_v1 = vpop.f32.mrf.mxu0  ;;  %v1056_v2 = vpop.f32.mrf.mxu1 }
 0x11b   :  { %737 = vst [vmem:[%s1768_s3 + $0x50] sm:$0xff] %v459_v63  ;;  %769 = vst [vmem:[%s1768_s3 + $0x150] sm:$0xff] %v619_v0  ;;  %v474_v3 = vadd.f32 %v1008_v1, %v1507_v16  ;;  %v634_v4 = vadd.f32 %v1056_v2, %v1507_v16 }
 0x11c   :  { %v468_v5 = vpop.f32.mrf.mxu0  ;;  %v628_v6 = vpop.f32.mrf.mxu1 }
 0x11d   :  { %740 = vst [vmem:[%s1768_s3 + $0x68] sm:$0xff] %v474_v3  ;;  %772 = vst [vmem:[%s1768_s3 + $0x168] sm:$0xff] %v634_v4  ;;  %v469_v7 = vadd.f32 %v1507_v16, %v468_v5  ;;  %v629_v8 = vadd.f32 %v1507_v16, %v628_v6 }
 0x11e   :  { %v1011_v9 = vpop.f32.mrf.mxu0  ;;  %v1059_v10 = vpop.f32.mrf.mxu1 }
 0x11f   :  { %739 = vst [vmem:[%s1768_s3 + $0x60] sm:$0xff] %v469_v7  ;;  %771 = vst [vmem:[%s1768_s3 + $0x160] sm:$0xff] %v629_v8  ;;  %v484_v11 = vadd.f32 %v1011_v9, %v1507_v16  ;;  %v644_v12 = vadd.f32 %v1059_v10, %v1507_v16 }
 0x120   :  { %v478_v13 = vpop.f32.mrf.mxu0  ;;  %v638_v14 = vpop.f32.mrf.mxu1 }
 0x121   :  { %742 = vst [vmem:[%s1768_s3 + $0x78] sm:$0xff] %v484_v11  ;;  %774 = vst [vmem:[%s1768_s3 + $0x178] sm:$0xff] %v644_v12  ;;  %v479_v15 = vadd.f32 %v1507_v16, %v478_v13  ;;  %v639_v17 = vadd.f32 %v1507_v16, %v638_v14 }
 0x122   :  { %v1014_v18 = vpop.f32.mrf.mxu0  ;;  %v1062_v19 = vpop.f32.mrf.mxu1 }
 0x123   :  { %741 = vst [vmem:[%s1768_s3 + $0x70] sm:$0xff] %v479_v15  ;;  %773 = vst [vmem:[%s1768_s3 + $0x170] sm:$0xff] %v639_v17  ;;  %v494_v20 = vadd.f32 %v1014_v18, %v1507_v16  ;;  %v654_v21 = vadd.f32 %v1062_v19, %v1507_v16 }
 0x124   :  { %v488_v22 = vpop.f32.mrf.mxu0  ;;  %v648_v23 = vpop.f32.mrf.mxu1 }
 0x125   :  { %744 = vst [vmem:[%s1768_s3 + $0x88] sm:$0xff] %v494_v20  ;;  %776 = vst [vmem:[%s1768_s3 + $0x188] sm:$0xff] %v654_v21  ;;  %v489_v24 = vadd.f32 %v1507_v16, %v488_v22  ;;  %v649_v25 = vadd.f32 %v1507_v16, %v648_v23 }
 0x126   :  { %v1017_v26 = vpop.f32.mrf.mxu0  ;;  %v1065_v27 = vpop.f32.mrf.mxu1 }
 0x127   :  { %743 = vst [vmem:[%s1768_s3 + $0x80] sm:$0xff] %v489_v24  ;;  %775 = vst [vmem:[%s1768_s3 + $0x180] sm:$0xff] %v649_v25  ;;  %v504_v28 = vadd.f32 %v1017_v26, %v1507_v16  ;;  %v664_v29 = vadd.f32 %v1065_v27, %v1507_v16 }
 0x128   :  { %v498_v30 = vpop.f32.mrf.mxu0  ;;  %v658_v31 = vpop.f32.mrf.mxu1 }
 0x129   :  { %746 = vst [vmem:[%s1768_s3 + $0x98] sm:$0xff] %v504_v28  ;;  %778 = vst [vmem:[%s1768_s3 + $0x198] sm:$0xff] %v664_v29  ;;  %v499_v32 = vadd.f32 %v1507_v16, %v498_v30  ;;  %v659_v33 = vadd.f32 %v1507_v16, %v658_v31 }
 0x12a   :  { %v1020_v34 = vpop.f32.mrf.mxu0  ;;  %v1068_v35 = vpop.f32.mrf.mxu1 }
 0x12b   :  { %745 = vst [vmem:[%s1768_s3 + $0x90] sm:$0xff] %v499_v32  ;;  %777 = vst [vmem:[%s1768_s3 + $0x190] sm:$0xff] %v659_v33  ;;  %v514_v36 = vadd.f32 %v1020_v34, %v1507_v16  ;;  %v674_v37 = vadd.f32 %v1068_v35, %v1507_v16 }
 0x12c   :  { %v508_v38 = vpop.f32.mrf.mxu0  ;;  %v668_v39 = vpop.f32.mrf.mxu1 }
 0x12d   :  { %748 = vst [vmem:[%s1768_s3 + $0xa8] sm:$0xff] %v514_v36  ;;  %780 = vst [vmem:[%s1768_s3 + $0x1a8] sm:$0xff] %v674_v37  ;;  %v509_v40 = vadd.f32 %v1507_v16, %v508_v38  ;;  %v669_v41 = vadd.f32 %v1507_v16, %v668_v39 }
 0x12e   :  { %v1023_v42 = vpop.f32.mrf.mxu0  ;;  %v1071_v43 = vpop.f32.mrf.mxu1 }
 0x12f   :  { %747 = vst [vmem:[%s1768_s3 + $0xa0] sm:$0xff] %v509_v40  ;;  %779 = vst [vmem:[%s1768_s3 + $0x1a0] sm:$0xff] %v669_v41  ;;  %v524_v44 = vadd.f32 %v1023_v42, %v1507_v16  ;;  %v684_v45 = vadd.f32 %v1071_v43, %v1507_v16 }
 0x130   :  { %v518_v46 = vpop.f32.mrf.mxu0  ;;  %v678_v47 = vpop.f32.mrf.mxu1 }
 0x131   :  { %750 = vst [vmem:[%s1768_s3 + $0xb8] sm:$0xff] %v524_v44  ;;  %782 = vst [vmem:[%s1768_s3 + $0x1b8] sm:$0xff] %v684_v45  ;;  %v519_v48 = vadd.f32 %v1507_v16, %v518_v46  ;;  %v679_v49 = vadd.f32 %v1507_v16, %v678_v47 }
 0x132   :  { %v1026_v50 = vpop.f32.mrf.mxu0  ;;  %v1074_v51 = vpop.f32.mrf.mxu1 }
 0x133   :  { %749 = vst [vmem:[%s1768_s3 + $0xb0] sm:$0xff] %v519_v48  ;;  %781 = vst [vmem:[%s1768_s3 + $0x1b0] sm:$0xff] %v679_v49  ;;  %v534_v52 = vadd.f32 %v1026_v50, %v1507_v16  ;;  %v694_v53 = vadd.f32 %v1074_v51, %v1507_v16 }
 0x134   :  { %v528_v54 = vpop.f32.mrf.mxu0  ;;  %v688_v55 = vpop.f32.mrf.mxu1 }
 0x135   :  { %752 = vst [vmem:[%s1768_s3 + $0xc8] sm:$0xff] %v534_v52  ;;  %784 = vst [vmem:[%s1768_s3 + $0x1c8] sm:$0xff] %v694_v53  ;;  %v529_v56 = vadd.f32 %v1507_v16, %v528_v54  ;;  %v689_v57 = vadd.f32 %v1507_v16, %v688_v55 }
 0x136   :  { %v1029_v58 = vpop.f32.mrf.mxu0  ;;  %v1077_v59 = vpop.f32.mrf.mxu1 }
 0x137   :  { %751 = vst [vmem:[%s1768_s3 + $0xc0] sm:$0xff] %v529_v56  ;;  %783 = vst [vmem:[%s1768_s3 + $0x1c0] sm:$0xff] %v689_v57  ;;  %v544_v60 = vadd.f32 %v1029_v58, %v1507_v16  ;;  %v704_v61 = vadd.f32 %v1077_v59, %v1507_v16 }
 0x138   :  { %v538_v62 = vpop.f32.mrf.mxu0  ;;  %v698_v63 = vpop.f32.mrf.mxu1 }
 0x139   :  { %754 = vst [vmem:[%s1768_s3 + $0xd8] sm:$0xff] %v544_v60  ;;  %786 = vst [vmem:[%s1768_s3 + $0x1d8] sm:$0xff] %v704_v61  ;;  %v539_v0 = vadd.f32 %v1507_v16, %v538_v62  ;;  %v699_v1 = vadd.f32 %v1507_v16, %v698_v63 }
 0x13a   :  { %v1032_v2 = vpop.f32.mrf.mxu0  ;;  %v1080_v3 = vpop.f32.mrf.mxu1 }
 0x13b   :  { %753 = vst [vmem:[%s1768_s3 + $0xd0] sm:$0xff] %v539_v0  ;;  %785 = vst [vmem:[%s1768_s3 + $0x1d0] sm:$0xff] %v699_v1  ;;  %v554_v4 = vadd.f32 %v1032_v2, %v1507_v16  ;;  %v714_v5 = vadd.f32 %v1080_v3, %v1507_v16 }
 0x13c   :  { %v548_v6 = vpop.f32.mrf.mxu0  ;;  %v708_v7 = vpop.f32.mrf.mxu1 }
 0x13d   :  { %756 = vst [vmem:[%s1768_s3 + $0xe8] sm:$0xff] %v554_v4  ;;  %788 = vst [vmem:[%s1768_s3 + $0x1e8] sm:$0xff] %v714_v5  ;;  %v549_v8 = vadd.f32 %v1507_v16, %v548_v6  ;;  %v709_v9 = vadd.f32 %v1507_v16, %v708_v7 }
 0x13e   :  { %v1035_v10 = vpop.f32.mrf.mxu0  ;;  %v1083_v11 = vpop.f32.mrf.mxu1 }
 0x13f   :  { %755 = vst [vmem:[%s1768_s3 + $0xe0] sm:$0xff] %v549_v8  ;;  %787 = vst [vmem:[%s1768_s3 + $0x1e0] sm:$0xff] %v709_v9  ;;  %v564_v12 = vadd.f32 %v1035_v10, %v1507_v16  ;;  %v724_v13 = vadd.f32 %v1083_v11, %v1507_v16 }
 0x140   :  { %v558_v14 = vpop.f32.mrf.mxu0  ;;  %v718_v15 = vpop.f32.mrf.mxu1 }
 0x141   :  { %758 = vst [vmem:[%s1768_s3 + $0xf8] sm:$0xff] %v564_v12  ;;  %790 = vst [vmem:[%s1768_s3 + $0x1f8] sm:$0xff] %v724_v13  ;;  %v559_v17 = vadd.f32 %v1507_v16, %v558_v14  ;;  %v719_v18 = vadd.f32 %v1507_v16, %v718_v15 }
 0x143   :  { %757 = vst [vmem:[%s1768_s3 + $0xf0] sm:$0xff] %v559_v17  ;;  %789 = vst [vmem:[%s1768_s3 + $0x1f0] sm:$0xff] %v719_v18 }

</bundles_post_ra>
